<compile_context>
chip_gen: v7x
topology: tpu7x:2x2x1
jax: 0.10.0
libtpu: 0.0.40
codegen_flags: <defaults>
</compile_context>

<pallas_src>
from functools import partial

import jax
import jax.numpy as jnp
from jax.experimental import pallas as pl
from jax.experimental.pallas import tpu as pltpu


NUM_HIDDEN = 5  # fixed by the nn.Sequential in model_DL_fully

_INV_SQRT2 = 0.7071067811865476
_SQRT_2_OVER_PI = 0.7978845608028654


def _gelu(x, approximate):
    if approximate:
        # tanh-approx GELU: the transcendental goes to the EUP slot (separate
        # VLIW slot) instead of a ~20-op VALU erf polynomial.
        return 0.5 * x * (1.0 + jnp.tanh(_SQRT_2_OVER_PI * (x + 0.044715 * x * x * x)))
    # Exact erf formulation == torch.nn.GELU() default.
    return 0.5 * x * (1.0 + jax.lax.erf(x * _INV_SQRT2))


def _mlp_kernel(x_ref,             # (TB, n)   batch tile, contiguous HBM read
                w0t_ref, b0_ref,   # (np, n), (np, 1)        input projection
                wht_ref, bh_ref,   # (H, np, np), (H, np, 1) hidden layers
                woutt_ref,         # (1, np)                 output projection
                bout_ref,          # (1, 1)                  scalar bias in SMEM
                o_ref,             # (1, TB)                 lane-dense output
                *, num_hidden, approximate_gelu):
    x = x_ref[...].astype(jnp.float32)

    # Input projection: contract the feature axis of (np, n) with (TB, n)
    # -> (np, TB); batch stays on the lane axis, no explicit transpose needed.
    h = jax.lax.dot_general(
        w0t_ref[...], x, (((1,), (1,)), ((), ())),
        preferred_element_type=jnp.float32) + b0_ref[...]
    h = _gelu(h, approximate_gelu)

    # 5 hidden Linear(np, np) + GELU layers (small static trip count: unrolled).
    for j in range(num_hidden):
        h = jnp.dot(wht_ref[j], h, preferred_element_type=jnp.float32) + bh_ref[j]
        h = _gelu(h, approximate_gelu)

    # Output projection: (1, np) @ (np, TB) -> (1, TB), lane-dense store.
    y = jnp.dot(woutt_ref[...], h, preferred_element_type=jnp.float32) + bout_ref[0, 0]
    o_ref[...] = y.astype(o_ref.dtype)


def _round_up(a, m):
    return (a + m - 1) // m * m


def _choose_batch_tile(B, block_b):
    """Lane-aligned batch tile; prefer >= 2 grid steps for large B (v7x megacore)."""
    tb = min(block_b, _round_up(B, 128))
    if B > 128:
        tb = min(tb, _round_up(pl.cdiv(B, 2), 128))
    return _round_up(max(tb, 128), 128)


def model_dl_fully_forward(x, params, *, block_b=4096, approximate_gelu=False):
    """x: (B, n) -> (B, 1), matching model_DL_fully.forward."""
    B, n = x.shape
    np_ = params["w0t"].shape[0]

    TB = _choose_batch_tile(B, block_b)
    grid = (pl.cdiv(B, TB),)

    def const_spec(shape):
        # Weights/biases: constant index_map -> VMEM-resident across grid steps.
        return pl.BlockSpec(shape, lambda i: (0,) * len(shape))

    in_specs = [
        pl.BlockSpec((TB, n), lambda i: (i, 0)),                 # x batch tile
        const_spec((np_, n)),                                    # w0t
        const_spec((np_, 1)),                                    # b0
        const_spec((NUM_HIDDEN, np_, np_)),                      # hidden weights
        const_spec((NUM_HIDDEN, np_, 1)),                        # hidden biases
        const_spec((1, np_)),                                    # woutt
        pl.BlockSpec(memory_space=pltpu.MemorySpace.SMEM),       # bout scalar
    ]
    out_spec = pl.BlockSpec((1, TB), lambda i: (0, i))

    out = pl.pallas_call(
        partial(_mlp_kernel, num_hidden=NUM_HIDDEN,
                approximate_gelu=approximate_gelu),
        out_shape=jax.ShapeDtypeStruct((1, B), x.dtype),
        grid=grid,
        in_specs=in_specs,
        out_specs=out_spec,
        compiler_params=pltpu.CompilerParams(
            dimension_semantics=("parallel",)),
    )(x, params["w0t"], params["b0"], params["wht"], params["bh"],
      params["woutt"], params["bout"])

    return out[0].reshape(B, 1)


def init_params(key, n, p=1, dtype=jnp.float32):
    """PyTorch-style uniform(-1/sqrt(fan_in), 1/sqrt(fan_in)) init.

    Weights are stored as (out_features, in_features) (torch layout); biases as
    (out_features, 1) columns to match the kernel's feature-major activations.
    """
    np_ = n * p
    ks = list(jax.random.split(key, 8))

    def u(k, shape, fan_in):
        bound = 1.0 / jnp.sqrt(fan_in)
        return jax.random.uniform(k, shape, dtype, -bound, bound)

    return {
        "w0t":   u(ks[0], (np_, n), n),                      # Linear(n, np).weight
        "b0":    u(ks[1], (np_, 1), n),                      # Linear(n, np).bias
        "wht":   u(ks[2], (NUM_HIDDEN, np_, np_), np_),      # 5x Linear(np, np).weight
        "bh":    u(ks[3], (NUM_HIDDEN, np_, 1), np_),        # 5x Linear(np, np).bias
        "woutt": u(ks[4], (1, np_), np_),                    # Linear(np, 1).weight
        "bout":  u(ks[5], (1, 1), np_),                      # Linear(np, 1).bias
    }


def reference_forward(x, params, approximate_gelu=False):
    """Pure-JAX reference of the PyTorch sequential forward for validation."""
    h = x @ params["w0t"].T + params["b0"][:, 0]
    h = _gelu(h, approximate_gelu)
    for j in range(NUM_HIDDEN):
        h = h @ params["wht"][j].T + params["bh"][j][:, 0]
        h = _gelu(h, approximate_gelu)
    return h @ params["woutt"].T + params["bout"][0, 0]   # (B, 1)


if __name__ == "__main__":
    n = 32
    p = 1

    key = jax.random.PRNGKey(0)
    kx, kp, kx2 = jax.random.split(key, 3)
    params = init_params(kp, n, p)

    # Small case: single grid step, ragged block (B=8 < TB=128).
    B = 8
    x = jax.random.normal(kx, (B, n), jnp.float32)
    out = jax.block_until_ready(model_dl_fully_forward(x, params))
    ref = reference_forward(x, params)
    assert out.shape == (B, 1), out.shape
    assert jnp.allclose(out, ref, atol=1e-4, rtol=1e-4), (out, ref)

    # Multi-tile case: >= 2 grid steps + ragged trailing block (200 = 128 + 72).
    B2 = 200
    x2 = jax.random.normal(kx2, (B2, n), jnp.float32)
    out2 = jax.block_until_ready(model_dl_fully_forward(x2, params, block_b=128))
    ref2 = reference_forward(x2, params)
    assert out2.shape == (B2, 1), out2.shape
    assert jnp.allclose(out2, ref2, atol=1e-4, rtol=1e-4), (out2, ref2)

    # Opt-in fast path: tanh-approx GELU (EUP-routed transcendental).  This
    # intentionally deviates slightly from torch's exact-erf GELU, so it is
    # validated against a matching approx reference.
    out3 = jax.block_until_ready(
        model_dl_fully_forward(x2, params, approximate_gelu=True))
    ref3 = reference_forward(x2, params, approximate_gelu=True)
    assert jnp.allclose(out3, ref3, atol=1e-3, rtol=1e-3), (out3, ref3)

    print("KERNEL_OK")
</pallas_src>

<mosaic_0001>
module attributes {stable_mosaic.version = 11 : i64} {
  func.func @_mlp_kernel(%arg0: i32, %arg1: memref<128x32xf32, #tpu.memory_space<vmem>>, %arg2: memref<32x32xf32, #tpu.memory_space<vmem>>, %arg3: memref<32x1xf32, #tpu.memory_space<vmem>>, %arg4: memref<5x32x32xf32, #tpu.memory_space<vmem>>, %arg5: memref<5x32x1xf32, #tpu.memory_space<vmem>>, %arg6: memref<1x32xf32, #tpu.memory_space<vmem>>, %arg7: memref<1x1xf32, #tpu.memory_space<smem>>, %arg8: memref<1x128xf32, #tpu.memory_space<vmem>>) attributes {dimension_semantics = [#tpu.dimension_semantics<parallel>], iteration_bounds = array<i64: 1>, scalar_prefetch = 0 : i64, scratch_operands = 0 : i64, tpu.core_type = #tpu.core_type<tc>, window_params = [{transform_indices = @transform_0, window_bounds = array<i64: 128, 32>}, {pipeline_mode = #tpu.pipeline_mode<synchronous>, transform_indices = @transform_1, window_bounds = array<i64: 32, 32>}, {pipeline_mode = #tpu.pipeline_mode<synchronous>, transform_indices = @transform_2, window_bounds = array<i64: 32, 1>}, {pipeline_mode = #tpu.pipeline_mode<synchronous>, transform_indices = @transform_3, window_bounds = array<i64: 5, 32, 32>}, {pipeline_mode = #tpu.pipeline_mode<synchronous>, transform_indices = @transform_4, window_bounds = array<i64: 5, 32, 1>}, {pipeline_mode = #tpu.pipeline_mode<synchronous>, transform_indices = @transform_5, window_bounds = array<i64: 1, 32>}, {transform_indices = @transform_6, window_bounds = array<i64: 1, 1>}, {transform_indices = @transform_7, window_bounds = array<i64: 1, 128>}]} {
    %c0 = arith.constant 0 : index
    %c0_0 = arith.constant 0 : index
    %0 = vector.load %arg1[%c0, %c0_0] : memref<128x32xf32, #tpu.memory_space<vmem>>, vector<128x32xf32>
    %c0_1 = arith.constant 0 : index
    %c0_2 = arith.constant 0 : index
    %1 = vector.load %arg2[%c0_1, %c0_2] : memref<32x32xf32, #tpu.memory_space<vmem>>, vector<32x32xf32>
    %cst = arith.constant dense<0.000000e+00> : vector<32x128xf32>
    %2 = tpu.matmul %1, %0, %cst {dimension_numbers = #tpu.dot_dimension_numbers<[1], [1], [0], [0], [0, 0, 1, 0], [], []>} : vector<32x32xf32>, vector<128x32xf32>, vector<32x128xf32> -> vector<32x128xf32>
    %c0_3 = arith.constant 0 : index
    %c0_4 = arith.constant 0 : index
    %3 = vector.load %arg3[%c0_3, %c0_4] : memref<32x1xf32, #tpu.memory_space<vmem>>, vector<32x1xf32>
    %4 = vector.broadcast %3 : vector<32x1xf32> to vector<32x128xf32>
    %5 = arith.addf %2, %4 : vector<32x128xf32>
    %cst_5 = arith.constant 5.000000e-01 : f32
    %6 = vector.broadcast %cst_5 : f32 to vector<32x128xf32>
    %7 = arith.mulf %6, %5 : vector<32x128xf32>
    %cst_6 = arith.constant 0.707106769 : f32
    %8 = vector.broadcast %cst_6 : f32 to vector<32x128xf32>
    %9 = arith.mulf %5, %8 : vector<32x128xf32>
    %10 = math.erf %9 : vector<32x128xf32>
    %cst_7 = arith.constant 1.000000e+00 : f32
    %11 = vector.broadcast %cst_7 : f32 to vector<32x128xf32>
    %12 = arith.addf %11, %10 : vector<32x128xf32>
    %13 = arith.mulf %7, %12 : vector<32x128xf32>
    %c0_8 = arith.constant 0 : index
    %c0_9 = arith.constant 0 : index
    %c0_10 = arith.constant 0 : index
    %14 = vector.load %arg4[%c0_8, %c0_9, %c0_10] : memref<5x32x32xf32, #tpu.memory_space<vmem>>, vector<1x32x32xf32>
    %15 = vector.shape_cast %14 : vector<1x32x32xf32> to vector<32x32xf32>
    %cst_11 = arith.constant dense<0.000000e+00> : vector<32x128xf32>
    %16 = tpu.matmul %15, %13, %cst_11 {dimension_numbers = #tpu.dot_dimension_numbers<[1], [0], [0], [1], [0, 0, 1, 1], [], []>} : vector<32x32xf32>, vector<32x128xf32>, vector<32x128xf32> -> vector<32x128xf32>
    %c0_12 = arith.constant 0 : index
    %c0_13 = arith.constant 0 : index
    %c0_14 = arith.constant 0 : index
    %17 = vector.load %arg5[%c0_12, %c0_13, %c0_14] : memref<5x32x1xf32, #tpu.memory_space<vmem>>, vector<1x32x1xf32>
    %18 = vector.shape_cast %17 : vector<1x32x1xf32> to vector<32x1xf32>
    %19 = vector.broadcast %18 : vector<32x1xf32> to vector<32x128xf32>
    %20 = arith.addf %16, %19 : vector<32x128xf32>
    %cst_15 = arith.constant 5.000000e-01 : f32
    %21 = vector.broadcast %cst_15 : f32 to vector<32x128xf32>
    %22 = arith.mulf %21, %20 : vector<32x128xf32>
    %cst_16 = arith.constant 0.707106769 : f32
    %23 = vector.broadcast %cst_16 : f32 to vector<32x128xf32>
    %24 = arith.mulf %20, %23 : vector<32x128xf32>
    %25 = math.erf %24 : vector<32x128xf32>
    %cst_17 = arith.constant 1.000000e+00 : f32
    %26 = vector.broadcast %cst_17 : f32 to vector<32x128xf32>
    %27 = arith.addf %26, %25 : vector<32x128xf32>
    %28 = arith.mulf %22, %27 : vector<32x128xf32>
    %c1 = arith.constant 1 : index
    %c0_18 = arith.constant 0 : index
    %c0_19 = arith.constant 0 : index
    %29 = vector.load %arg4[%c1, %c0_18, %c0_19] : memref<5x32x32xf32, #tpu.memory_space<vmem>>, vector<1x32x32xf32>
    %30 = vector.shape_cast %29 : vector<1x32x32xf32> to vector<32x32xf32>
    %cst_20 = arith.constant dense<0.000000e+00> : vector<32x128xf32>
    %31 = tpu.matmul %30, %28, %cst_20 {dimension_numbers = #tpu.dot_dimension_numbers<[1], [0], [0], [1], [0, 0, 1, 1], [], []>} : vector<32x32xf32>, vector<32x128xf32>, vector<32x128xf32> -> vector<32x128xf32>
    %c1_21 = arith.constant 1 : index
    %c0_22 = arith.constant 0 : index
    %c0_23 = arith.constant 0 : index
    %32 = vector.load %arg5[%c1_21, %c0_22, %c0_23] : memref<5x32x1xf32, #tpu.memory_space<vmem>>, vector<1x32x1xf32>
    %33 = vector.shape_cast %32 : vector<1x32x1xf32> to vector<32x1xf32>
    %34 = vector.broadcast %33 : vector<32x1xf32> to vector<32x128xf32>
    %35 = arith.addf %31, %34 : vector<32x128xf32>
    %cst_24 = arith.constant 5.000000e-01 : f32
    %36 = vector.broadcast %cst_24 : f32 to vector<32x128xf32>
    %37 = arith.mulf %36, %35 : vector<32x128xf32>
    %cst_25 = arith.constant 0.707106769 : f32
    %38 = vector.broadcast %cst_25 : f32 to vector<32x128xf32>
    %39 = arith.mulf %35, %38 : vector<32x128xf32>
    %40 = math.erf %39 : vector<32x128xf32>
    %cst_26 = arith.constant 1.000000e+00 : f32
    %41 = vector.broadcast %cst_26 : f32 to vector<32x128xf32>
    %42 = arith.addf %41, %40 : vector<32x128xf32>
    %43 = arith.mulf %37, %42 : vector<32x128xf32>
    %c2 = arith.constant 2 : index
    %c0_27 = arith.constant 0 : index
    %c0_28 = arith.constant 0 : index
    %44 = vector.load %arg4[%c2, %c0_27, %c0_28] : memref<5x32x32xf32, #tpu.memory_space<vmem>>, vector<1x32x32xf32>
    %45 = vector.shape_cast %44 : vector<1x32x32xf32> to vector<32x32xf32>
    %cst_29 = arith.constant dense<0.000000e+00> : vector<32x128xf32>
    %46 = tpu.matmul %45, %43, %cst_29 {dimension_numbers = #tpu.dot_dimension_numbers<[1], [0], [0], [1], [0, 0, 1, 1], [], []>} : vector<32x32xf32>, vector<32x128xf32>, vector<32x128xf32> -> vector<32x128xf32>
    %c2_30 = arith.constant 2 : index
    %c0_31 = arith.constant 0 : index
    %c0_32 = arith.constant 0 : index
    %47 = vector.load %arg5[%c2_30, %c0_31, %c0_32] : memref<5x32x1xf32, #tpu.memory_space<vmem>>, vector<1x32x1xf32>
    %48 = vector.shape_cast %47 : vector<1x32x1xf32> to vector<32x1xf32>
    %49 = vector.broadcast %48 : vector<32x1xf32> to vector<32x128xf32>
    %50 = arith.addf %46, %49 : vector<32x128xf32>
    %cst_33 = arith.constant 5.000000e-01 : f32
    %51 = vector.broadcast %cst_33 : f32 to vector<32x128xf32>
    %52 = arith.mulf %51, %50 : vector<32x128xf32>
    %cst_34 = arith.constant 0.707106769 : f32
    %53 = vector.broadcast %cst_34 : f32 to vector<32x128xf32>
    %54 = arith.mulf %50, %53 : vector<32x128xf32>
    %55 = math.erf %54 : vector<32x128xf32>
    %cst_35 = arith.constant 1.000000e+00 : f32
    %56 = vector.broadcast %cst_35 : f32 to vector<32x128xf32>
    %57 = arith.addf %56, %55 : vector<32x128xf32>
    %58 = arith.mulf %52, %57 : vector<32x128xf32>
    %c3 = arith.constant 3 : index
    %c0_36 = arith.constant 0 : index
    %c0_37 = arith.constant 0 : index
    %59 = vector.load %arg4[%c3, %c0_36, %c0_37] : memref<5x32x32xf32, #tpu.memory_space<vmem>>, vector<1x32x32xf32>
    %60 = vector.shape_cast %59 : vector<1x32x32xf32> to vector<32x32xf32>
    %cst_38 = arith.constant dense<0.000000e+00> : vector<32x128xf32>
    %61 = tpu.matmul %60, %58, %cst_38 {dimension_numbers = #tpu.dot_dimension_numbers<[1], [0], [0], [1], [0, 0, 1, 1], [], []>} : vector<32x32xf32>, vector<32x128xf32>, vector<32x128xf32> -> vector<32x128xf32>
    %c3_39 = arith.constant 3 : index
    %c0_40 = arith.constant 0 : index
    %c0_41 = arith.constant 0 : index
    %62 = vector.load %arg5[%c3_39, %c0_40, %c0_41] : memref<5x32x1xf32, #tpu.memory_space<vmem>>, vector<1x32x1xf32>
    %63 = vector.shape_cast %62 : vector<1x32x1xf32> to vector<32x1xf32>
    %64 = vector.broadcast %63 : vector<32x1xf32> to vector<32x128xf32>
    %65 = arith.addf %61, %64 : vector<32x128xf32>
    %cst_42 = arith.constant 5.000000e-01 : f32
    %66 = vector.broadcast %cst_42 : f32 to vector<32x128xf32>
    %67 = arith.mulf %66, %65 : vector<32x128xf32>
    %cst_43 = arith.constant 0.707106769 : f32
    %68 = vector.broadcast %cst_43 : f32 to vector<32x128xf32>
    %69 = arith.mulf %65, %68 : vector<32x128xf32>
    %70 = math.erf %69 : vector<32x128xf32>
    %cst_44 = arith.constant 1.000000e+00 : f32
    %71 = vector.broadcast %cst_44 : f32 to vector<32x128xf32>
    %72 = arith.addf %71, %70 : vector<32x128xf32>
    %73 = arith.mulf %67, %72 : vector<32x128xf32>
    %c4 = arith.constant 4 : index
    %c0_45 = arith.constant 0 : index
    %c0_46 = arith.constant 0 : index
    %74 = vector.load %arg4[%c4, %c0_45, %c0_46] : memref<5x32x32xf32, #tpu.memory_space<vmem>>, vector<1x32x32xf32>
    %75 = vector.shape_cast %74 : vector<1x32x32xf32> to vector<32x32xf32>
    %cst_47 = arith.constant dense<0.000000e+00> : vector<32x128xf32>
    %76 = tpu.matmul %75, %73, %cst_47 {dimension_numbers = #tpu.dot_dimension_numbers<[1], [0], [0], [1], [0, 0, 1, 1], [], []>} : vector<32x32xf32>, vector<32x128xf32>, vector<32x128xf32> -> vector<32x128xf32>
    %c4_48 = arith.constant 4 : index
    %c0_49 = arith.constant 0 : index
    %c0_50 = arith.constant 0 : index
    %77 = vector.load %arg5[%c4_48, %c0_49, %c0_50] : memref<5x32x1xf32, #tpu.memory_space<vmem>>, vector<1x32x1xf32>
    %78 = vector.shape_cast %77 : vector<1x32x1xf32> to vector<32x1xf32>
    %79 = vector.broadcast %78 : vector<32x1xf32> to vector<32x128xf32>
    %80 = arith.addf %76, %79 : vector<32x128xf32>
    %cst_51 = arith.constant 5.000000e-01 : f32
    %81 = vector.broadcast %cst_51 : f32 to vector<32x128xf32>
    %82 = arith.mulf %81, %80 : vector<32x128xf32>
    %cst_52 = arith.constant 0.707106769 : f32
    %83 = vector.broadcast %cst_52 : f32 to vector<32x128xf32>
    %84 = arith.mulf %80, %83 : vector<32x128xf32>
    %85 = math.erf %84 : vector<32x128xf32>
    %cst_53 = arith.constant 1.000000e+00 : f32
    %86 = vector.broadcast %cst_53 : f32 to vector<32x128xf32>
    %87 = arith.addf %86, %85 : vector<32x128xf32>
    %88 = arith.mulf %82, %87 : vector<32x128xf32>
    %c0_54 = arith.constant 0 : index
    %c0_55 = arith.constant 0 : index
    %89 = vector.load %arg6[%c0_54, %c0_55] : memref<1x32xf32, #tpu.memory_space<vmem>>, vector<1x32xf32>
    %cst_56 = arith.constant dense<0.000000e+00> : vector<1x128xf32>
    %90 = tpu.matmul %89, %88, %cst_56 {dimension_numbers = #tpu.dot_dimension_numbers<[1], [0], [0], [1], [0, 0, 1, 1], [], []>} : vector<1x32xf32>, vector<32x128xf32>, vector<1x128xf32> -> vector<1x128xf32>
    %c0_57 = arith.constant 0 : index
    %c0_58 = arith.constant 0 : index
    %91 = memref.load %arg7[%c0_57, %c0_58] : memref<1x1xf32, #tpu.memory_space<smem>>
    %92 = vector.broadcast %91 : f32 to vector<1x128xf32>
    %93 = arith.addf %90, %92 : vector<1x128xf32>
    %c0_59 = arith.constant 0 : index
    %c0_60 = arith.constant 0 : index
    %94 = vector.load %arg8[%c0_59, %c0_60] : memref<1x128xf32, #tpu.memory_space<vmem>>, vector<1x128xf32>
    tpu.vector_store %arg8[%c0_59, %c0_60], %93 {strides = array<i32>} : memref<1x128xf32, #tpu.memory_space<vmem>>, vector<1x128xf32>,
    return
  }
  func.func @transform_0(%arg0: i32) -> (i32, i32) {
    %c0_i32 = arith.constant 0 : i32
    %c0_i32_0 = arith.constant 0 : i32
    return %arg0, %c0_i32 : i32, i32
  }
  func.func @transform_1(%arg0: i32) -> (i32, i32) {
    %c0_i32 = arith.constant 0 : i32
    %c0_i32_0 = arith.constant 0 : i32
    %c0_i32_1 = arith.constant 0 : i32
    return %c0_i32, %c0_i32_0 : i32, i32
  }
  func.func @transform_2(%arg0: i32) -> (i32, i32) {
    %c0_i32 = arith.constant 0 : i32
    %c0_i32_0 = arith.constant 0 : i32
    %c0_i32_1 = arith.constant 0 : i32
    return %c0_i32, %c0_i32_0 : i32, i32
  }
  func.func @transform_3(%arg0: i32) -> (i32, i32, i32) {
    %c0_i32 = arith.constant 0 : i32
    %c0_i32_0 = arith.constant 0 : i32
    %c0_i32_1 = arith.constant 0 : i32
    %c0_i32_2 = arith.constant 0 : i32
    return %c0_i32, %c0_i32_0, %c0_i32_1 : i32, i32, i32
  }
  func.func @transform_4(%arg0: i32) -> (i32, i32, i32) {
    %c0_i32 = arith.constant 0 : i32
    %c0_i32_0 = arith.constant 0 : i32
    %c0_i32_1 = arith.constant 0 : i32
    %c0_i32_2 = arith.constant 0 : i32
    return %c0_i32, %c0_i32_0, %c0_i32_1 : i32, i32, i32
  }
  func.func @transform_5(%arg0: i32) -> (i32, i32) {
    %c0_i32 = arith.constant 0 : i32
    %c0_i32_0 = arith.constant 0 : i32
    %c0_i32_1 = arith.constant 0 : i32
    return %c0_i32, %c0_i32_0 : i32, i32
  }
  func.func @transform_6(%arg0: i32) -> (i32, i32) {
    %c0_i32 = arith.constant 0 : i32
    %c0_i32_0 = arith.constant 0 : i32
    %c0_i32_1 = arith.constant 0 : i32
    return %c0_i32, %c0_i32_0 : i32, i32
  }
  func.func @transform_7(%arg0: i32) -> (i32, i32) {
    %c0_i32 = arith.constant 0 : i32
    %c0_i32_0 = arith.constant 0 : i32
    return %c0_i32, %arg0 : i32, i32
  }
}

</mosaic_0001>

<bundles_post_ra>
// kernel: tpu_custom_call.1
= control target key start
LH: loop header
LB: loop body
LE: loop exit
PB: predicated region body
PF: predicated region fallthrough
CT: control target
= control target key end

     0   :  { %vm72_vm0 = vcmask 261120   ;;  %v1492_v6 = vmov 0   ;;  %s1810_s0 = inlined_call_operand.vmem [shape: f32[8,32], index: 0, kind: input, shape index: {}]   ;;  %s1811_s1 = inlined_call_operand.vmem [shape: f32[32,32], index: 1, kind: input, shape index: {}]   ;;  %s1812_s2 = inlined_call_operand.vmem [shape: f32[32,1], index: 2, kind: input, shape index: {}]   ;;  %s1813_s3 = inlined_call_operand.vmem [shape: f32[5,32,32], index: 3, kind: input, shape index: {}]   ;;  %s1814_s4 = inlined_call_operand.vmem [shape: f32[5,32,1], index: 4, kind: input, shape index: {}]   ;;  %s1815_s5 = inlined_call_operand.vmem [shape: f32[1,32], index: 5, kind: input, shape index: {}]   ;;  %s1816_s6 = inlined_call_operand.<no memory space> [shape: f32[1,1], index: 6, kind: input, shape index: {}]   ;;  %s1817_s7 = inlined_call_operand.hbm [shape: f32[1,8], index: 7, kind: output, shape index: {}]  }
   0x1   :  { %v28_v0 = vld [vmem:[%s1810_s0] sm:$0xff]  ;;  %v29_v1 = vld [vmem:[%s1810_s0 + $0x8] sm:$0xff]  ;;  %v30_v2 = vld [vmem:[%s1810_s0 + $0x10] sm:$0xff]  ;;  %1418 = vset.pattern.permute.xlu0 %v1492_v6  ;;  %1419 = vset.pattern.permute.xlu1 %v1492_v6 }
   0x2   :  { %v1319_v3 = vpack.c.bf16 %v29_v1, %v28_v0  ;;  %vm1548_vm1 = vmpackc.low %vm72_vm0, %vm72_vm0  ;;  %v31_v5 = vld [vmem:[%s1810_s0 + $0x18] sm:$0xff]  ;;  %v44_v8 = vld [vmem:[%s1811_s1] sm:$0xff] }
   0x3   :  { %v1325_v7 = vpack.c.bf16 %v31_v5, %v30_v2  ;;  %v32_v9 = vld [vmem:[%s1810_s0 + $0x20] sm:$0xff]  ;;  %v33_v10 = vld [vmem:[%s1810_s0 + $0x28] sm:$0xff]  ;;  %1232 = vmatprep.mubr.msk.f32.mxu0 %vm72_vm0, %v44_v8  ;;  %v50_v12 = vld [vmem:[%s1812_s2 + $0x10] sm:$0xff] }
   0x4   :  { %1321 = vmatprep.subr.msk.bf16.mxu0 %vm1548_vm1, %v1319_v3  ;;  %v48_v11 = vld [vmem:[%s1812_s2] sm:$0xff]  ;;  %64 = vperm.xlu1 %1419, %v50_v12   ;;  %v1331_v13 = vpack.c.bf16 %v33_v10, %v32_v9  ;;  %v49_v14 = vld [vmem:[%s1812_s2 + $0x8] sm:$0xff]  ;;  %v51_v15 = vld [vmem:[%s1812_s2 + $0x18] sm:$0xff] }
   0x5   :  { %1324 = vmatpush3.bf16.xpose.msk.msra.mxu0 %vm1548_vm1, %v1319_v3  ;;  %54 = vperm.xlu0 %1418, %v48_v11   ;;  %v242_v16 = vld [vmem:[%s1814_s4] sm:$0xff]  ;;  %v34_v17 = vld [vmem:[%s1810_s0 + $0x30] sm:$0xff]  ;;  %v35_v18 = vld [vmem:[%s1810_s0 + $0x38] sm:$0xff] }
   0x6   :  { %1327 = vmatprep.subr.msk.bf16.mxu0 %vm1548_vm1, %v1325_v7  ;;  %v243_v19 = vld [vmem:[%s1814_s4 + $0x8] sm:$0xff] }
   0x8   :  { %69 = vperm.xlu1 %1419, %v51_v15  }
   0x9   :  { %59 = vperm.xlu0 %1418, %v49_v14  }
   0xd   :  { %1330 = vmatpush3.bf16.xpose.msk.msra.mxu0 %vm1548_vm1, %v1325_v7 }
   0xe   :  { %1333 = vmatprep.subr.msk.bf16.mxu0 %vm1548_vm1, %v1331_v13 }
   0xf   :  { %13 = vsyncpa [#allocation4], 0  ;;  %248 = vperm.xlu0 %1418, %v242_v16   ;;  %v1337_v20 = vpack.c.bf16 %v35_v18, %v34_v17  ;;  %253 = vperm.xlu1 %1419, %v243_v19   ;;  %v244_v21 = vld [vmem:[%s1814_s4 + $0x10] sm:$0xff]  ;;  %v245_v22 = vld [vmem:[%s1814_s4 + $0x18] sm:$0xff]  ;;  %vm1494_vm2 = vmmov 0   ;;  %s1496_s29 = smov [#allocation3]  }
  0x10   :  { %v1090_v23 = vld [vmem:[%s1814_s4 + $0x20] sm:$0xff]  ;;  %v37_v25 = vld [vmem:[%s1810_s0 + $0x48] sm:$0xff]  ;;  %v1092_v28 = vld [vmem:[%s1814_s4 + $0x30] sm:$0xff]  ;;  %s1054_s30 = sshll.u32 %s1496_s29, 4  ;;  %s1055_s30 = int_to_ptr.vmem [resolvable:$true] %s1054_s30 }
  0x11   :  { %v36_v24 = vld [vmem:[%s1810_s0 + $0x40] sm:$0xff]  ;;  %v1091_v26 = vld [vmem:[%s1814_s4 + $0x28] sm:$0xff]  ;;  %v1093_v29 = vld [vmem:[%s1814_s4 + $0x38] sm:$0xff]  ;;  %s1468_s8 = scalar_lea.vmem %s1055_s30, 16  ;;  %s1472_s9 = scalar_lea.vmem %s1055_s30, 32 }
  0x12   :  { %v1343_v27 = vpack.c.bf16 %v37_v25, %v36_v24  ;;  %v1102_v30 = vld [vmem:[%s1814_s4 + $0x40] sm:$0xff]  ;;  %v38_v31 = vld [vmem:[%s1810_s0 + $0x50] sm:$0xff]  ;;  %v39_v32 = vld [vmem:[%s1810_s0 + $0x58] sm:$0xff]  ;;  %p1469_p0 = scmp.ne.s32.totalorder %s1055_s30, %s1468_s8  ;;  %p1473_p1 = scmp.lt.s32.totalorder %s1055_s30, %s1055_s30 }
  0x13   :  { %258 = vperm.xlu0 %1418, %v244_v21   ;;  %263 = vperm.xlu1 %1419, %v245_v22   ;;  %v1103_v33 = vld [vmem:[%s1814_s4 + $0x48] sm:$0xff]  ;;  %v1349_v34 = vpack.c.bf16 %v39_v32, %v38_v31  ;;  %v1104_v35 = vld [vmem:[%s1814_s4 + $0x50] sm:$0xff]  ;;  %v1105_v36 = vld [vmem:[%s1814_s4 + $0x58] sm:$0xff]  ;;  %p1474_p2 = scmp.lt.s32.totalorder %s1472_s9, %s1468_s8 }
  0x14   :  { %v1114_v37 = vld [vmem:[%s1814_s4 + $0x60] sm:$0xff]  ;;  %v41_v39 = vld [vmem:[%s1810_s0 + $0x68] sm:$0xff]  ;;  %v1116_v42 = vld [vmem:[%s1814_s4 + $0x70] sm:$0xff] }
  0x15   :  { %1336 = vmatpush3.bf16.xpose.msk.msra.mxu0 %vm1548_vm1, %v1331_v13  ;;  %v40_v38 = vld [vmem:[%s1810_s0 + $0x60] sm:$0xff]  ;;  %v1115_v40 = vld [vmem:[%s1814_s4 + $0x68] sm:$0xff]  ;;  %v1117_v43 = vld [vmem:[%s1814_s4 + $0x78] sm:$0xff]  ;;  %p1475_p3 = por %p1474_p2, %p1473_p1 }
  0x16   :  { %1339 = vmatprep.subr.msk.bf16.mxu0 %vm1548_vm1, %v1337_v20  ;;  %v1355_v41 = vpack.c.bf16 %v41_v39, %v40_v38  ;;  %v1126_v44 = vld [vmem:[%s1814_s4 + $0x80] sm:$0xff]  ;;  %v42_v45 = vld [vmem:[%s1810_s0 + $0x70] sm:$0xff]  ;;  %v43_v46 = vld [vmem:[%s1810_s0 + $0x78] sm:$0xff] }
  0x17   :  { %395 = vperm.xlu0 %1418, %v1090_v23   ;;  %400 = vperm.xlu1 %1419, %v1091_v26   ;;  %v1127_v47 = vld [vmem:[%s1814_s4 + $0x88] sm:$0xff]  ;;  %v1361_v48 = vpack.c.bf16 %v43_v46, %v42_v45  ;;  %v1128_v49 = vld [vmem:[%s1814_s4 + $0x90] sm:$0xff]  ;;  %v1129_v50 = vld [vmem:[%s1814_s4 + $0x98] sm:$0xff]  ;;  %p1476_p4 = pnand %p1475_p3, %p1469_p0 }
  0x18   :  { %v45_v51 = vld [vmem:[%s1811_s1 + $0x8] sm:$0xff]  ;;  %v46_v52 = vld [vmem:[%s1811_s1 + $0x10] sm:$0xff]  ;;  %v47_v53 = vld [vmem:[%s1811_s1 + $0x18] sm:$0xff] }
  0x19   :  { %v238_v54 = vld [vmem:[%s1813_s3] sm:$0xff]  ;;  %v239_v25 = vld [vmem:[%s1813_s3 + $0x8] sm:$0xff]  ;;  %v240_v26 = vld [vmem:[%s1813_s3 + $0x10] sm:$0xff] }
  0x1a   :  { %1246 = vmatprep.mubr.msk.f32.mxu1 %vm72_vm0, %v238_v54 }
  0x1b   :  { %405 = vperm.xlu0 %1418, %v1092_v28   ;;  %410 = vperm.xlu1 %1419, %v1093_v29   ;;  %v1086_v28 = vld [vmem:[%s1813_s3 + $0x20] sm:$0xff] }
  0x1d   :  { %1342 = vmatpush3.bf16.xpose.msk.msra.mxu0 %vm1548_vm1, %v1337_v20 }
  0x1e   :  { %1345 = vmatprep.subr.msk.bf16.mxu0 %vm1548_vm1, %v1343_v27 }
  0x1f   :  { %542 = vperm.xlu0 %1418, %v1102_v30   ;;  %547 = vperm.xlu1 %1419, %v1103_v33  }
  0x23   :  { %552 = vperm.xlu0 %1418, %v1104_v35   ;;  %557 = vperm.xlu1 %1419, %v1105_v36  }
  0x25   :  { %1348 = vmatpush3.bf16.xpose.msk.msra.mxu0 %vm1548_vm1, %v1343_v27  ;;  %v241_v27 = vld [vmem:[%s1813_s3 + $0x18] sm:$0xff] }
  0x26   :  { %1351 = vmatprep.subr.msk.bf16.mxu0 %vm1548_vm1, %v1349_v34 }
  0x27   :  { %689 = vperm.xlu0 %1418, %v1114_v37   ;;  %694 = vperm.xlu1 %1419, %v1115_v40  }
  0x2b   :  { %699 = vperm.xlu0 %1418, %v1116_v42   ;;  %704 = vperm.xlu1 %1419, %v1117_v43  }
  0x2d   :  { %1354 = vmatpush3.bf16.xpose.msk.msra.mxu0 %vm1548_vm1, %v1349_v34 }
  0x2e   :  { %1357 = vmatprep.subr.msk.bf16.mxu0 %vm1548_vm1, %v1355_v41 }
  0x2f   :  { %836 = vperm.xlu0 %1418, %v1126_v44   ;;  %841 = vperm.xlu1 %1419, %v1127_v47  }
  0x33   :  { %846 = vperm.xlu0 %1418, %v1128_v49   ;;  %851 = vperm.xlu1 %1419, %v1129_v50  }
  0x35   :  { %1360 = vmatpush3.bf16.xpose.msk.msra.mxu0 %vm1548_vm1, %v1355_v41 }
  0x36   :  { %1363 = vmatprep.subr.msk.bf16.mxu0 %vm1548_vm1, %v1361_v48 }
  0x3d   :  { %1366 = vmatpush3.bf16.xpose.msk.msra.mxu0 %vm1548_vm1, %v1361_v48 }
  0x44   :  { %1233 = vmatmul.mubr.msk.f32.vlgmr.msra.gmra.mrb[0].mxu0 %vm72_vm0, %v45_v51 }
  0x45   :  { %1235 = vmatprep.mubr.msk.f32.mxu0 %vm72_vm0, %v46_v52 }
  0x48   :  { %1236 = vmatmul.mubr.msk.f32.gmra.mrb[2].mxu0 %vm72_vm0, %v47_v53 }
  0x83   :  { %v65_v56 = vpop.permute.xlu1 %64 }
  0x84   :  { %v55_v55 = vpop.permute.xlu0 %54 }
  0x87   :  { %v70_v63 = vpop.permute.xlu1 %69 }
  0x88   :  { %v60_v57 = vpop.permute.xlu0 %59 }
  0x8e   :  { %v254_v29 = vpop.permute.xlu1 %253  ;;  %v249_v30 = vpop.permute.xlu0 %248 }
  0x92   :  { %v264_v36 = vpop.permute.xlu1 %263  ;;  %v259_v39 = vpop.permute.xlu0 %258 }
 0x117   :  { %v1234_v58 = vpop.f32.mrb[0].mxu0 }
 0x118   :  { %v205_v59 = vadd.f32 %v1234_v58, %v60_v57  ;;  %v199_v60 = vpop.f32.mrb[1].mxu0 }
 0x119   :  { %v200_v61 = vadd.f32 %v199_v60, %v55_v55 }
 0x11a   :  { %v223_v62 = vmul.f32 0.70710677, %v205_v59  ;;  %v219_v9 = vmul.f32 0.5, %v205_v59 }
 0x11b   :  { %v222_v0 = vmul.f32 0.70710677, %v200_v61  ;;  %v1237_v1 = vpop.f32.mrb[2].mxu0  ;;  %v218_v11 = vmul.f32 0.5, %v200_v61 }
 0x11c   :  { %1420 = verf.f32 %v223_v62  ;;  %v215_v2 = vadd.f32 %v1237_v1, %v70_v63  ;;  %v209_v3 = vpop.f32.mrb[3].mxu0  ;;  %v1087_v63 = vld [vmem:[%s1813_s3 + $0x28] sm:$0xff]  ;;  %v1089_v1 = vld [vmem:[%s1813_s3 + $0x38] sm:$0xff] }
 0x11d   :  { %1422 = verf.f32 %v222_v0  ;;  %v210_v4 = vadd.f32 %v209_v3, %v65_v56  ;;  %v1088_v0 = vld [vmem:[%s1813_s3 + $0x30] sm:$0xff]  ;;  %v401_v3 = vpop.permute.xlu1 %400 }
 0x11e   :  { %v225_v5 = vmul.f32 0.70710677, %v215_v2  ;;  %v221_v17 = vmul.f32 0.5, %v215_v2  ;;  %v1098_v2 = vld [vmem:[%s1813_s3 + $0x40] sm:$0xff] }
 0x11f   :  { %v224_v6 = vmul.f32 0.70710677, %v210_v4  ;;  %v220_v19 = vmul.f32 0.5, %v210_v4  ;;  %v396_v4 = vpop.permute.xlu0 %395 }
 0x120   :  { %1424 = verf.f32 %v225_v5 }
 0x121   :  { %1426 = verf.f32 %v224_v6 }
 0x126   :  { %v1421_v7 = vpop.eup %1420 }
 0x127   :  { %v1423_v8 = vpop.eup %1422  ;;  %v231_v10 = vadd.f32 1.0, %v1421_v7 }
 0x128   :  { %v230_v12 = vadd.f32 1.0, %v1423_v8 }
 0x129   :  { %v235_v13 = vmul.f32 %v231_v10, %v219_v9  ;;  %v411_v10 = vpop.permute.xlu1 %410 }
 0x12a   :  { %v1425_v14 = vpop.eup %1424  ;;  %v234_v15 = vmul.f32 %v230_v12, %v218_v11 }
 0x12b   :  { %v1427_v16 = vpop.eup %1426  ;;  %v233_v18 = vadd.f32 1.0, %v1425_v14 }
 0x12c   :  { %v232_v20 = vadd.f32 1.0, %v1427_v16  ;;  %v1367_v21 = vpack.c.bf16 %v235_v13, %v234_v15  ;;  %v406_v13 = vpop.permute.xlu0 %405 }
 0x12d   :  { %v237_v22 = vmul.f32 %v233_v18, %v221_v17 }
 0x12e   :  { %v236_v23 = vmul.f32 %v232_v20, %v220_v19  ;;  %1368 = vmatprep.subr.bf16.mxu1 %v1367_v21 }
 0x12f   :  { %1370 = vmatpush3.bf16.msra.mxu1 %v1367_v21 }
 0x130   :  { %v1371_v24 = vpack.c.bf16 %v237_v22, %v236_v23 }
 0x132   :  { %1372 = vmatprep.subr.bf16.mxu1 %v1371_v24 }
 0x133   :  { %1374 = vmatpush3.bf16.msra.mxu1 %v1371_v24 }
 0x136   :  { %1247 = vmatmul.mubr.msk.f32.vlgmr.msra.gmra.mrb[0].mxu1 %vm72_vm0, %v239_v25 }
 0x137   :  { %1249 = vmatprep.mubr.msk.f32.mxu1 %vm72_vm0, %v240_v26 }
 0x13a   :  { %1250 = vmatmul.mubr.msk.f32.gmra.mrb[2].mxu1 %vm72_vm0, %v241_v27 }
 0x13b   :  { %1260 = vmatprep.mubr.msk.f32.mxu1 %vm72_vm0, %v1086_v28 }
 0x209   :  { %v1248_v31 = vpop.f32.mrb[0].mxu1 }
 0x20a   :  { %v350_v32 = vadd.f32 %v1248_v31, %v254_v29  ;;  %v344_v33 = vpop.f32.mrb[1].mxu1 }
 0x20b   :  { %v345_v34 = vadd.f32 %v344_v33, %v249_v30 }
 0x20c   :  { %v368_v35 = vmul.f32 0.70710677, %v350_v32  ;;  %v364_v47 = vmul.f32 0.5, %v350_v32 }
 0x20d   :  { %v367_v37 = vmul.f32 0.70710677, %v345_v34  ;;  %v1251_v38 = vpop.f32.mrb[2].mxu1  ;;  %v363_v49 = vmul.f32 0.5, %v345_v34 }
 0x20e   :  { %1428 = verf.f32 %v368_v35  ;;  %v360_v40 = vadd.f32 %v1251_v38, %v264_v36  ;;  %v354_v41 = vpop.f32.mrb[3].mxu1  ;;  %v1100_v38 = vld [vmem:[%s1813_s3 + $0x50] sm:$0xff] }
 0x20f   :  { %1430 = verf.f32 %v367_v37  ;;  %v355_v42 = vadd.f32 %v354_v41, %v259_v39  ;;  %v1099_v37 = vld [vmem:[%s1813_s3 + $0x48] sm:$0xff]  ;;  %v1101_v39 = vld [vmem:[%s1813_s3 + $0x58] sm:$0xff]  ;;  %v548_v41 = vpop.permute.xlu1 %547 }
 0x210   :  { %v370_v43 = vmul.f32 0.70710677, %v360_v40  ;;  %v366_v55 = vmul.f32 0.5, %v360_v40  ;;  %v1110_v40 = vld [vmem:[%s1813_s3 + $0x60] sm:$0xff] }
 0x211   :  { %v369_v44 = vmul.f32 0.70710677, %v355_v42  ;;  %v365_v57 = vmul.f32 0.5, %v355_v42  ;;  %v543_v42 = vpop.permute.xlu0 %542 }
 0x212   :  { %1432 = verf.f32 %v370_v43 }
 0x213   :  { %1434 = verf.f32 %v369_v44 }
 0x218   :  { %v1429_v45 = vpop.eup %1428 }
 0x219   :  { %v1431_v46 = vpop.eup %1430  ;;  %v376_v48 = vadd.f32 1.0, %v1429_v45 }
 0x21a   :  { %v375_v50 = vadd.f32 1.0, %v1431_v46 }
 0x21b   :  { %v380_v51 = vmul.f32 %v376_v48, %v364_v47  ;;  %v558_v48 = vpop.permute.xlu1 %557 }
 0x21c   :  { %v1433_v52 = vpop.eup %1432  ;;  %v379_v53 = vmul.f32 %v375_v50, %v363_v49 }
 0x21d   :  { %v1435_v54 = vpop.eup %1434  ;;  %v378_v56 = vadd.f32 1.0, %v1433_v52 }
 0x21e   :  { %v377_v58 = vadd.f32 1.0, %v1435_v54  ;;  %v1375_v59 = vpack.c.bf16 %v380_v51, %v379_v53  ;;  %v553_v51 = vpop.permute.xlu0 %552 }
 0x21f   :  { %v382_v60 = vmul.f32 %v378_v56, %v366_v55 }
 0x220   :  { %v381_v61 = vmul.f32 %v377_v58, %v365_v57  ;;  %1376 = vmatprep.subr.bf16.mxu1 %v1375_v59 }
 0x221   :  { %1378 = vmatpush3.bf16.msra.mxu1 %v1375_v59 }
 0x222   :  { %v1379_v62 = vpack.c.bf16 %v382_v60, %v381_v61 }
 0x224   :  { %1380 = vmatprep.subr.bf16.mxu1 %v1379_v62 }
 0x225   :  { %1382 = vmatpush3.bf16.msra.mxu1 %v1379_v62 }
 0x228   :  { %1261 = vmatmul.mubr.msk.f32.vlgmr.msra.gmra.mrb[4].mxu1 %vm72_vm0, %v1087_v63 }
 0x229   :  { %1263 = vmatprep.mubr.msk.f32.mxu1 %vm72_vm0, %v1088_v0 }
 0x22c   :  { %1264 = vmatmul.mubr.msk.f32.gmra.mrb[6].mxu1 %vm72_vm0, %v1089_v1 }
 0x22d   :  { %1274 = vmatprep.mubr.msk.f32.mxu1 %vm72_vm0, %v1098_v2 }
 0x2fb   :  { %v1262_v5 = vpop.f32.mrb[4].mxu1 }
 0x2fc   :  { %v497_v6 = vadd.f32 %v1262_v5, %v401_v3  ;;  %v491_v7 = vpop.f32.mrb[5].mxu1 }
 0x2fd   :  { %v492_v8 = vadd.f32 %v491_v7, %v396_v4 }
 0x2fe   :  { %v515_v9 = vmul.f32 0.70710677, %v497_v6  ;;  %v511_v21 = vmul.f32 0.5, %v497_v6 }
 0x2ff   :  { %v514_v11 = vmul.f32 0.70710677, %v492_v8  ;;  %v1265_v12 = vpop.f32.mrb[6].mxu1  ;;  %v510_v23 = vmul.f32 0.5, %v492_v8 }
 0x300   :  { %1436 = verf.f32 %v515_v9  ;;  %v507_v14 = vadd.f32 %v1265_v12, %v411_v10  ;;  %v501_v15 = vpop.f32.mrb[7].mxu1  ;;  %v1112_v12 = vld [vmem:[%s1813_s3 + $0x70] sm:$0xff] }
 0x301   :  { %1438 = verf.f32 %v514_v11  ;;  %v502_v16 = vadd.f32 %v501_v15, %v406_v13  ;;  %v1111_v11 = vld [vmem:[%s1813_s3 + $0x68] sm:$0xff]  ;;  %v1113_v13 = vld [vmem:[%s1813_s3 + $0x78] sm:$0xff]  ;;  %v695_v15 = vpop.permute.xlu1 %694 }
 0x302   :  { %v517_v17 = vmul.f32 0.70710677, %v507_v14  ;;  %v513_v29 = vmul.f32 0.5, %v507_v14  ;;  %v1122_v14 = vld [vmem:[%s1813_s3 + $0x80] sm:$0xff] }
 0x303   :  { %v516_v18 = vmul.f32 0.70710677, %v502_v16  ;;  %v512_v31 = vmul.f32 0.5, %v502_v16  ;;  %v690_v16 = vpop.permute.xlu0 %689 }
 0x304   :  { %1440 = verf.f32 %v517_v17 }
 0x305   :  { %1442 = verf.f32 %v516_v18 }
 0x30a   :  { %v1437_v19 = vpop.eup %1436 }
 0x30b   :  { %v1439_v20 = vpop.eup %1438  ;;  %v523_v22 = vadd.f32 1.0, %v1437_v19 }
 0x30c   :  { %v522_v24 = vadd.f32 1.0, %v1439_v20 }
 0x30d   :  { %v527_v25 = vmul.f32 %v523_v22, %v511_v21  ;;  %v705_v22 = vpop.permute.xlu1 %704 }
 0x30e   :  { %v1441_v26 = vpop.eup %1440  ;;  %v526_v27 = vmul.f32 %v522_v24, %v510_v23 }
 0x30f   :  { %v1443_v28 = vpop.eup %1442  ;;  %v525_v30 = vadd.f32 1.0, %v1441_v26 }
 0x310   :  { %v524_v32 = vadd.f32 1.0, %v1443_v28  ;;  %v1383_v33 = vpack.c.bf16 %v527_v25, %v526_v27  ;;  %v700_v25 = vpop.permute.xlu0 %699 }
 0x311   :  { %v529_v34 = vmul.f32 %v525_v30, %v513_v29 }
 0x312   :  { %v528_v35 = vmul.f32 %v524_v32, %v512_v31  ;;  %1384 = vmatprep.subr.bf16.mxu1 %v1383_v33 }
 0x313   :  { %1386 = vmatpush3.bf16.msra.mxu1 %v1383_v33 }
 0x314   :  { %v1387_v36 = vpack.c.bf16 %v529_v34, %v528_v35 }
 0x316   :  { %1388 = vmatprep.subr.bf16.mxu1 %v1387_v36 }
 0x317   :  { %1390 = vmatpush3.bf16.msra.mxu1 %v1387_v36 }
 0x31a   :  { %1275 = vmatmul.mubr.msk.f32.vlgmr.msra.gmra.mrb[8].mxu1 %vm72_vm0, %v1099_v37 }
 0x31b   :  { %1277 = vmatprep.mubr.msk.f32.mxu1 %vm72_vm0, %v1100_v38 }
 0x31e   :  { %1278 = vmatmul.mubr.msk.f32.gmra.mrb[10].mxu1 %vm72_vm0, %v1101_v39 }
 0x31f   :  { %1288 = vmatprep.mubr.msk.f32.mxu1 %vm72_vm0, %v1110_v40 }
 0x3ed   :  { %v1276_v43 = vpop.f32.mrb[8].mxu1 }
 0x3ee   :  { %v644_v44 = vadd.f32 %v1276_v43, %v548_v41  ;;  %v638_v45 = vpop.f32.mrb[9].mxu1 }
 0x3ef   :  { %v639_v46 = vadd.f32 %v638_v45, %v543_v42 }
 0x3f0   :  { %v662_v47 = vmul.f32 0.70710677, %v644_v44  ;;  %v658_v59 = vmul.f32 0.5, %v644_v44 }
 0x3f1   :  { %v661_v49 = vmul.f32 0.70710677, %v639_v46  ;;  %v1279_v50 = vpop.f32.mrb[10].mxu1  ;;  %v657_v61 = vmul.f32 0.5, %v639_v46 }
 0x3f2   :  { %1444 = verf.f32 %v662_v47  ;;  %v654_v52 = vadd.f32 %v1279_v50, %v558_v48  ;;  %v648_v53 = vpop.f32.mrb[11].mxu1  ;;  %v1124_v50 = vld [vmem:[%s1813_s3 + $0x90] sm:$0xff] }
 0x3f3   :  { %1446 = verf.f32 %v661_v49  ;;  %v649_v54 = vadd.f32 %v648_v53, %v553_v51  ;;  %v1123_v49 = vld [vmem:[%s1813_s3 + $0x88] sm:$0xff]  ;;  %v1125_v51 = vld [vmem:[%s1813_s3 + $0x98] sm:$0xff]  ;;  %v1495_v53 = vmov 0.0  }
 0x3f4   :  { %v664_v55 = vmul.f32 0.70710677, %v654_v52  ;;  %v660_v3 = vmul.f32 0.5, %v654_v52  ;;  %v1493_v52 = vmov 0.0|0.0  }
 0x3f5   :  { %v663_v56 = vmul.f32 0.70710677, %v649_v54  ;;  %v659_v5 = vmul.f32 0.5, %v649_v54  ;;  %v842_v54 = vpop.permute.xlu1 %841 }
 0x3f6   :  { %1448 = verf.f32 %v664_v55  ;;  %v837_v55 = vpop.permute.xlu0 %836 }
 0x3f7   :  { %1450 = verf.f32 %v663_v56 }
 0x3fc   :  { %v1445_v57 = vpop.eup %1444 }
 0x3fd   :  { %v1447_v58 = vpop.eup %1446  ;;  %v670_v60 = vadd.f32 1.0, %v1445_v57 }
 0x3fe   :  { %v669_v62 = vadd.f32 1.0, %v1447_v58 }
 0x3ff   :  { %v674_v63 = vmul.f32 %v670_v60, %v658_v59 }
 0x400   :  { %v1449_v0 = vpop.eup %1448  ;;  %v673_v1 = vmul.f32 %v669_v62, %v657_v61  ;;  %v852_v61 = vpop.permute.xlu1 %851 }
 0x401   :  { %v1451_v2 = vpop.eup %1450  ;;  %v672_v4 = vadd.f32 1.0, %v1449_v0  ;;  %v847_v0 = vpop.permute.xlu0 %846 }
 0x402   :  { %v671_v6 = vadd.f32 1.0, %v1451_v2  ;;  %v1391_v7 = vpack.c.bf16 %v674_v63, %v673_v1 }
 0x403   :  { %v676_v8 = vmul.f32 %v672_v4, %v660_v3 }
 0x404   :  { %v675_v9 = vmul.f32 %v671_v6, %v659_v5  ;;  %1392 = vmatprep.subr.bf16.mxu1 %v1391_v7 }
 0x405   :  { %1394 = vmatpush3.bf16.msra.mxu1 %v1391_v7 }
 0x406   :  { %v1395_v10 = vpack.c.bf16 %v676_v8, %v675_v9 }
 0x408   :  { %1396 = vmatprep.subr.bf16.mxu1 %v1395_v10 }
 0x409   :  { %1398 = vmatpush3.bf16.msra.mxu1 %v1395_v10 }
 0x40c   :  { %1289 = vmatmul.mubr.msk.f32.vlgmr.msra.gmra.mrb[12].mxu1 %vm72_vm0, %v1111_v11 }
 0x40d   :  { %1291 = vmatprep.mubr.msk.f32.mxu1 %vm72_vm0, %v1112_v12 }
 0x410   :  { %1292 = vmatmul.mubr.msk.f32.gmra.mrb[14].mxu1 %vm72_vm0, %v1113_v13 }
 0x411   :  { %1302 = vmatprep.mubr.msk.f32.mxu1 %vm72_vm0, %v1122_v14 }
 0x4df   :  { %v1290_v17 = vpop.f32.mrb[12].mxu1 }
 0x4e0   :  { %v791_v18 = vadd.f32 %v1290_v17, %v695_v15  ;;  %v785_v19 = vpop.f32.mrb[13].mxu1 }
 0x4e1   :  { %v786_v20 = vadd.f32 %v785_v19, %v690_v16 }
 0x4e2   :  { %v809_v21 = vmul.f32 0.70710677, %v791_v18  ;;  %v805_v33 = vmul.f32 0.5, %v791_v18 }
 0x4e3   :  { %v808_v23 = vmul.f32 0.70710677, %v786_v20  ;;  %v1293_v24 = vpop.f32.mrb[14].mxu1  ;;  %v804_v35 = vmul.f32 0.5, %v786_v20 }
 0x4e4   :  { %1452 = verf.f32 %v809_v21  ;;  %v801_v26 = vadd.f32 %v1293_v24, %v705_v22  ;;  %v795_v27 = vpop.f32.mrb[15].mxu1  ;;  %v971_v24 = vld [vmem:[%s1815_s5] sm:$0x1] }
 0x4e5   :  { %1454 = verf.f32 %v808_v23  ;;  %v796_v28 = vadd.f32 %v795_v27, %v700_v25  ;;  %v973_v25 = vstv %s1816_s6 }
 0x4e6   :  { %v811_v29 = vmul.f32 0.70710677, %v801_v26  ;;  %v807_v41 = vmul.f32 0.5, %v801_v26 }
 0x4e7   :  { %v810_v30 = vmul.f32 0.70710677, %v796_v28  ;;  %v806_v43 = vmul.f32 0.5, %v796_v28 }
 0x4e8   :  { %1456 = verf.f32 %v811_v29 }
 0x4e9   :  { %1458 = verf.f32 %v810_v30 }
 0x4ee   :  { %v1453_v31 = vpop.eup %1452 }
 0x4ef   :  { %v1455_v32 = vpop.eup %1454  ;;  %v817_v34 = vadd.f32 1.0, %v1453_v31 }
 0x4f0   :  { %v816_v36 = vadd.f32 1.0, %v1455_v32 }
 0x4f1   :  { %v821_v37 = vmul.f32 %v817_v34, %v805_v33 }
 0x4f2   :  { %v1457_v38 = vpop.eup %1456  ;;  %v820_v39 = vmul.f32 %v816_v36, %v804_v35 }
 0x4f3   :  { %v1459_v40 = vpop.eup %1458  ;;  %v819_v42 = vadd.f32 1.0, %v1457_v38 }
 0x4f4   :  { %v818_v44 = vadd.f32 1.0, %v1459_v40  ;;  %v1399_v45 = vpack.c.bf16 %v821_v37, %v820_v39 }
 0x4f5   :  { %v823_v46 = vmul.f32 %v819_v42, %v807_v41 }
 0x4f6   :  { %v822_v47 = vmul.f32 %v818_v44, %v806_v43  ;;  %1400 = vmatprep.subr.bf16.mxu1 %v1399_v45 }
 0x4f7   :  { %1402 = vmatpush3.bf16.msra.mxu1 %v1399_v45 }
 0x4f8   :  { %v1403_v48 = vpack.c.bf16 %v823_v46, %v822_v47 }
 0x4fa   :  { %1404 = vmatprep.subr.bf16.mxu1 %v1403_v48 }
 0x4fb   :  { %1406 = vmatpush3.bf16.msra.mxu1 %v1403_v48 }
 0x4fc   :  { %1407 = vmatprep.subr.bf16.mxu1 %v1493_v52 }
 0x4fe   :  { %1303 = vmatmul.mubr.msk.f32.vlgmr.msra.gmra.mrb[16].mxu1 %vm72_vm0, %v1123_v49 }
 0x4ff   :  { %1305 = vmatprep.mubr.msk.f32.mxu1 %vm72_vm0, %v1124_v50 }
 0x502   :  { %1306 = vmatmul.mubr.msk.f32.gmra.mrb[18].mxu1 %vm72_vm0, %v1125_v51 }
 0x503   :  { %1316 = vmatprep.mubr.msk.f32.mxu1 %vm1494_vm2, %v1495_v53 }
 0x5d1   :  { %v1304_v56 = vpop.f32.mrb[16].mxu1 }
 0x5d2   :  { %v938_v57 = vadd.f32 %v1304_v56, %v842_v54  ;;  %v932_v58 = vpop.f32.mrb[17].mxu1 }
 0x5d3   :  { %v933_v59 = vadd.f32 %v932_v58, %v837_v55 }
 0x5d4   :  { %v956_v60 = vmul.f32 0.70710677, %v938_v57  ;;  %v952_v8 = vmul.f32 0.5, %v938_v57 }
 0x5d5   :  { %v955_v62 = vmul.f32 0.70710677, %v933_v59  ;;  %v1307_v63 = vpop.f32.mrb[18].mxu1  ;;  %v951_v10 = vmul.f32 0.5, %v933_v59 }
 0x5d6   :  { %1460 = verf.f32 %v956_v60  ;;  %v948_v1 = vadd.f32 %v1307_v63, %v852_v61  ;;  %v942_v2 = vpop.f32.mrb[19].mxu1 }
 0x5d7   :  { %1462 = verf.f32 %v955_v62  ;;  %v943_v3 = vadd.f32 %v942_v2, %v847_v0 }
 0x5d8   :  { %v958_v4 = vmul.f32 0.70710677, %v948_v1  ;;  %v954_v16 = vmul.f32 0.5, %v948_v1 }
 0x5d9   :  { %v957_v5 = vmul.f32 0.70710677, %v943_v3  ;;  %v953_v19 = vmul.f32 0.5, %v943_v3 }
 0x5da   :  { %1464 = verf.f32 %v958_v4 }
 0x5db   :  { %1466 = verf.f32 %v957_v5 }
 0x5e0   :  { %v1461_v6 = vpop.eup %1460 }
 0x5e1   :  { %v1463_v7 = vpop.eup %1462  ;;  %v964_v9 = vadd.f32 1.0, %v1461_v6 }
 0x5e2   :  { %v963_v11 = vadd.f32 1.0, %v1463_v7 }
 0x5e3   :  { %v968_v12 = vmul.f32 %v964_v9, %v952_v8 }
 0x5e4   :  { %v1465_v13 = vpop.eup %1464  ;;  %v967_v14 = vmul.f32 %v963_v11, %v951_v10 }
 0x5e5   :  { %v1467_v15 = vpop.eup %1466  ;;  %v966_v17 = vadd.f32 1.0, %v1465_v13 }
 0x5e6   :  { %v1408_v18 = vpack.c.bf16 %v968_v12, %v967_v14  ;;  %v965_v20 = vadd.f32 1.0, %v1467_v15 }
 0x5e7   :  { %v970_v21 = vmul.f32 %v966_v17, %v954_v16 }
 0x5e8   :  { %v969_v22 = vmul.f32 %v965_v20, %v953_v19  ;;  %1409 = vmatpush3.bf16.msra.mxu1 %v1408_v18 }
 0x5e9   :  { %1410 = vmatprep.subr.bf16.mxu1 %v1493_v52 }
 0x5ea   :  { %v1411_v23 = vpack.c.bf16 %v970_v21, %v969_v22 }
 0x5ec   :  { %1412 = vmatpush3.bf16.msra.mxu1 %v1411_v23 }
 0x5ef   :  { %1317 = vmatmul.mubr.msk.f32.vlgmr.msra.gmra.mrb[20].mxu1 %vm72_vm0, %v971_v24 }
 0x6c2   :  { %v1043_v26 = vpop.f32.mrb[20].mxu1 }
 0x6c3   :  { %v1044_v27 = vadd.f32 %v1043_v26, %v973_v25  ;;  %v1318_v28 = vpop.f32.mrb[21].mxu1 }
 0x6c5   :  { %1047 = vst [vmem:[#allocation3] sm:$0x1] %v1044_v27 }
 0x6c6   :  { %1479 = shalt.err (!%p1476_p4)
}
 0x6c7   :  { %s1480_s0 = scalar_lea.hbm %s1817_s7, 16 }
 0x6c8   :  { %p1481_p5 = scmp.ne.s32.totalorder %s1817_s7, %s1480_s0  ;;  %p1484_p6 = scmp.lt.u32.totalorder %s1480_s0, %s1817_s7 }
 0x6ca   :  { %p1486_p7 = pnand %p1484_p6, %p1481_p5 }
 0x6cc   :  { %1489 = shalt.err (!%p1486_p7)
}
 0x6cd   :  { %1057 = dma.vmem_to_hbm [thread:$0]  %s1055_s30, 16, %s1817_s7, [#allocation4]  }
 0x6ce   :  { %1490 = dma.done.wait [#allocation4], 16  }
 0x6cf   :  { %1491 = vsyncadd [#allocation4], 4294967280 }
 0x6d0   :  { %1061 = vsyncpa [#allocation4], 1 }

</bundles_post_ra>
